<compile_context>
chip_gen: v5e
topology: v5e:2x2
jax: 0.10.0
libtpu: 0.0.40
codegen_flags: <defaults>
</compile_context>

<pallas_src>
import functools
import math

import jax
import jax.numpy as jnp
import numpy as np
from jax import lax
from jax.experimental import pallas as pl
from jax.experimental.pallas import tpu as pltpu


def _round_up(x, m):
    return ((x + m - 1) // m) * m


def _cin_aug(cin):
    # +1 for the ones (bias) row; round to 16 = bf16 sublane tile (32 if ever int8).
    return _round_up(cin + 1, 16)


# --------------------------------------------------------------------------- kernel

def audionet_kernel(xs_ref, mask_ref, w1_ref, w2_ref, wpbd_ref, bp_ref, out_ref, *, seq):
    """One batch chunk: Bt batch elements folded into the lane axis (batch-major, time-minor).

    xs_ref   : (Cin_aug, N)           bf16  activation channels + ones row + zero pad, N = Bt*L
    mask_ref : (2, N)                 f32   row0 = 1.0 where t>=1, row1 = 1.0 where t>=2
    w1_ref   : (3*seq, 3*Cin_aug)     bf16  [tap k=0 | k=1 | k=2(+res 1x1)+bias col] fused
    w2_ref   : (seq, 3*seq)           bf16  conv2 taps concatenated along the tap axis
    wpbd_ref : (N, Bt*hidden)         bf16  block-diagonal emb_proj weight
    bp_ref   : (1, Bt*hidden)         f32   emb_proj bias tiled per batch element
    out_ref  : (seq, Bt*hidden)
    """
    x = xs_ref[...]                               # (Cin_aug, N)
    N = x.shape[1]
    m1 = mask_ref[0:1, :]                         # (1, N): kills cross-batch leak for shift 1
    m2 = mask_ref[1:2, :]                         # (1, N): ... for shift 2

    def causal_shift(a, s, m_row):
        # Shift right by s along lanes; zero the first s time-steps of every batch element.
        rolled = jnp.concatenate(
            [jnp.zeros((a.shape[0], s), a.dtype), a[:, :N - s]], axis=1)
        return rolled * m_row.astype(a.dtype)     # exact 0/1 mask

    # In-kernel 3-tap causal stack (activation DMA'd once; shifts land on VPU/XLU slack).
    x_stack = jnp.concatenate(
        [causal_shift(x, 2, m2), causal_shift(x, 1, m1), x], axis=0)      # (3*Cin_aug, N)

    # conv1 (all 3 taps) + residual 1x1 conv + all three biases: ONE MXU matmul
    # (bias-column trick against the ones row of the unshifted block).
    y = jnp.dot(w1_ref[...], x_stack, preferred_element_type=jnp.float32)  # (3*seq, N)
    y1 = jnp.maximum(y[0:seq], 0.0)               # causal conv1 -> ReLU (Dropout = identity)
    res = y[seq:2 * seq]                          # residual downsample (1x1 conv) + bds
    b2b = y[2 * seq:3 * seq]                      # b2 broadcast over all lanes

    # conv2: causal 3-tap stack of y1 -> ONE matmul.
    y1_stack = jnp.concatenate(
        [causal_shift(y1, 2, m2), causal_shift(y1, 1, m1), y1], axis=0)   # (3*seq, N)
    y2 = jnp.dot(w2_ref[...], y1_stack.astype(w2_ref.dtype),
                 preferred_element_type=jnp.float32) + b2b
    y2 = jnp.maximum(y2, 0.0)

    tcn = jnp.maximum(y2 + res, 0.0)              # (seq, N); already >= 0 so emb_proj's
                                                  # leading ReLU is a no-op (removed).

    # emb_proj Linear over the time axis for the whole chunk: ONE lane-dense matmul.
    out = jnp.dot(tcn.astype(wpbd_ref.dtype), wpbd_ref[...],
                  preferred_element_type=jnp.float32) + bp_ref[...]
    out_ref[...] = out.astype(out_ref.dtype)


# ------------------------------------------------------------------- block policy

def _pick_block(B, L, hidden):
    """Pick (Bt, nblk): Bt batch elements folded into the lane axis per grid block.

    * N = Bt*L and Nout = Bt*hidden multiples of 128 (lane-dense stores, full MXU lanes),
      padding the batch with zero rows when B is tiny.
    * v5e/v6e (single TC): fat ~512-lane blocks to amortize per-grid-step overhead.
    * v7x (2 TCs): prefer >= 2 'parallel' blocks when there is enough real batch.
    * Bt is capped so the block-diagonal emb_proj weight (Bt*L, Bt*hidden) bf16 stays
      a few hundred KB -> far below scoped VMEM on every generation.
    """
    unit = math.lcm(128 // math.gcd(L, 128), 128 // math.gcd(hidden, 128))
    if unit * max(L, hidden) > 4096:
        # Exact 128-lane alignment would need an absurd fold; keep >=128 lanes, one block.
        return max(B, pl.cdiv(128, L)), 1

    kind = ""
    try:
        kind = jax.devices()[0].device_kind.lower()
    except Exception:
        pass
    multi_tc = "v7" in kind                     # v7x: 2 TensorCores per chip
    lane_target = 256 if multi_tc else 512

    def round_unit(n):
        return max(unit, pl.cdiv(n, unit) * unit)

    bt_cap = max(unit, (1024 // max(L, hidden)) // unit * unit)   # wp_bd <= ~2 MiB bf16
    if B <= unit:
        return unit, 1                           # pad batch with zeros, single grid step
    bt = min(round_unit(pl.cdiv(lane_target, L)), bt_cap, round_unit(B))
    nblk = pl.cdiv(B, bt)
    if multi_tc and nblk == 1 and bt > unit:
        # Split so both TensorCores receive work on v7x.
        bt = max(unit, round_unit(pl.cdiv(B, 2)))
        nblk = pl.cdiv(B, bt)
    return bt, nblk


# ------------------------------------------------------------------ weight packing

def pack_params(params, Bt, *, compute_dtype=jnp.bfloat16):
    """One-time, host-side weight prepacking for a given batch fold Bt (hoisted out of
    the per-forward path).  Returns device arrays only."""
    seq, Cin, K = params["w1"].shape
    assert K == 3
    hidden, L = params["wp"].shape
    Cin_aug = _cin_aug(Cin)

    w1 = np.asarray(params["w1"], np.float32)               # (seq, Cin, 3)
    wds = np.asarray(params["wds"], np.float32)[:, :, 0]    # (seq, Cin)
    b1 = np.asarray(params["b1"], np.float32)
    b2 = np.asarray(params["b2"], np.float32)
    bds = np.asarray(params["bds"], np.float32)

    # Fused (3*seq, 3*Cin_aug): rows [conv1 | residual | b2-bias]; column blocks are
    # conv taps k=0,1,2 (matched in-kernel with shifts 2,1,0); residual 1x1 and the
    # bias column live in the UNshifted (k=2) block.
    w1_aug = np.zeros((3 * seq, 3 * Cin_aug), np.float32)
    for k in range(3):
        w1_aug[0:seq, k * Cin_aug:k * Cin_aug + Cin] = w1[:, :, k]
    w1_aug[seq:2 * seq, 2 * Cin_aug:2 * Cin_aug + Cin] = wds
    bias_col = 2 * Cin_aug + Cin                 # lines up with the ones row (unshifted)
    w1_aug[0:seq, bias_col] = b1
    w1_aug[seq:2 * seq, bias_col] = bds
    w1_aug[2 * seq:3 * seq, bias_col] = b2

    w2 = np.asarray(params["w2"], np.float32)    # (seq, seq, 3)
    w2_cat = np.transpose(w2, (0, 2, 1)).reshape(seq, 3 * seq)

    # Block-diagonal emb_proj weight: Linear over time for Bt batch elems at once
    # (Bt is capped by _pick_block, so this stays small).
    wp = np.asarray(params["wp"], np.float32)    # (hidden, L)
    wp_bd = np.kron(np.eye(Bt, dtype=np.float32), wp.T)      # (Bt*L, Bt*hidden)
    bp_row = np.tile(np.asarray(params["bp"], np.float32), Bt)[None, :]

    # Static causal masks (columns are batch-major / time-minor): avoids vector '%'.
    t_in = np.tile(np.arange(L, dtype=np.int64), Bt)
    mask = np.stack([(t_in >= 1), (t_in >= 2)]).astype(np.float32)  # (2, Bt*L)

    return {
        "w1_aug": jnp.asarray(w1_aug, compute_dtype),
        "w2_cat": jnp.asarray(w2_cat, compute_dtype),
        "wp_bd": jnp.asarray(wp_bd, compute_dtype),
        "bp_row": jnp.asarray(bp_row, jnp.float32),
        "mask": jnp.asarray(mask, jnp.float32),
    }


# ------------------------------------------------------------------------- forward

def audionet_apply(x_nchw, packed, *, seq, Cin, L, hidden, Bt,
                   compute_dtype=jnp.bfloat16, out_dtype=jnp.float32):
    """x_nchw: (B, C, H, W) float32 -> (B, seq_len(=W), hidden) float32."""
    B, C, H, W = x_nchw.shape
    assert C * W == Cin and H == L and W == seq
    Cin_aug = _cin_aug(Cin)
    nblk = pl.cdiv(B, Bt)
    B_pad = Bt * nblk
    N = Bt * L
    Nout = Bt * hidden

    # einops 'b c h w -> b (c w) h'
    x = jnp.transpose(x_nchw, (0, 1, 3, 2)).reshape(B, Cin, L)
    # Ones row for the bias-column trick + zero rows up to the bf16 sublane tile.
    xa = jnp.concatenate(
        [x, jnp.ones((B, 1, L), x.dtype),
         jnp.zeros((B, Cin_aug - Cin - 1, L), x.dtype)], axis=1)       # (B, Cin_aug, L)
    if B_pad != B:
        xa = jnp.concatenate(
            [xa, jnp.zeros((B_pad - B, Cin_aug, L), xa.dtype)], axis=0)
    # Fold batch into the lane axis: columns ordered batch-major, time-minor.
    xs_flat = jnp.transpose(xa, (1, 0, 2)).reshape(Cin_aug, B_pad * L).astype(compute_dtype)

    def full_spec(a):
        nd = a.ndim
        return pl.BlockSpec(a.shape, lambda g, nd=nd: (0,) * nd)

    flops = 2 * nblk * N * (3 * seq * 3 * Cin_aug + seq * 3 * seq + seq * Nout)
    bytes_accessed = int(
        xs_flat.size * xs_flat.dtype.itemsize
        + sum(packed[k].size * packed[k].dtype.itemsize
              for k in ("mask", "w1_aug", "w2_cat", "wp_bd", "bp_row"))
        + seq * B_pad * hidden * jnp.dtype(out_dtype).itemsize)

    kern = functools.partial(audionet_kernel, seq=seq)
    out2d = pl.pallas_call(
        kern,
        out_shape=jax.ShapeDtypeStruct((seq, B_pad * hidden), out_dtype),
        grid=(nblk,),
        in_specs=[
            pl.BlockSpec((Cin_aug, N), lambda g: (0, g)),
            full_spec(packed["mask"]),
            full_spec(packed["w1_aug"]),
            full_spec(packed["w2_cat"]),
            full_spec(packed["wp_bd"]),
            full_spec(packed["bp_row"]),
        ],
        out_specs=pl.BlockSpec((seq, Nout), lambda g: (0, g)),
        compiler_params=pltpu.CompilerParams(
            dimension_semantics=("parallel",)),
        cost_estimate=pl.CostEstimate(
            flops=flops, transcendentals=0, bytes_accessed=bytes_accessed),
    )(xs_flat, packed["mask"], packed["w1_aug"], packed["w2_cat"],
      packed["wp_bd"], packed["bp_row"])

    # Lane-dense (seq, B_pad*hidden) slab -> (B, seq, hidden); padded rows sliced off.
    return out2d.reshape(seq, B_pad, hidden).transpose(1, 0, 2)[:B].astype(jnp.float32)


def build_forward(params, batch_size, *, compute_dtype=jnp.bfloat16, out_dtype=jnp.float32):
    """Pick the block policy, prepack weights once, return (jitted forward, packed)."""
    seq, Cin, _k = params["w1"].shape
    hidden, L = params["wp"].shape
    Bt, _ = _pick_block(batch_size, L, hidden)
    packed = pack_params(params, Bt, compute_dtype=compute_dtype)
    fwd = jax.jit(functools.partial(
        audionet_apply, seq=seq, Cin=Cin, L=L, hidden=hidden, Bt=Bt,
        compute_dtype=compute_dtype, out_dtype=out_dtype))
    return fwd, packed


# ----------------------------------------------------------------------- reference

def ref_forward(x_nchw, params):
    """Pure-JAX reference (lax.conv, float32) for correctness checking."""
    B, C, H, W = x_nchw.shape
    x = jnp.transpose(x_nchw, (0, 1, 3, 2)).reshape(B, C * W, H)

    def conv1d_chomp(x, w, b, pad):
        y = lax.conv_general_dilated(
            x, w, window_strides=(1,), padding=[(pad, pad)],
            dimension_numbers=("NCH", "OIH", "NCH"))
        y = y + b[None, :, None]
        return y[:, :, :-pad]

    y1 = jax.nn.relu(conv1d_chomp(x, params["w1"], params["b1"], 2))
    y2 = jax.nn.relu(conv1d_chomp(y1, params["w2"], params["b2"], 2))
    res = (jnp.einsum("oc,bcl->bol", params["wds"][:, :, 0], x)
           + params["bds"][None, :, None])
    tcn = jax.nn.relu(y2 + res)
    h = jax.nn.relu(tcn)
    return jnp.einsum("bsl,hl->bsh", h, params["wp"]) + params["bp"]


if __name__ == "__main__":
    # cfg equivalent: nonlinear=True, latent_dim=32, combined_latent=32, seq_len=4,
    # tcn_channels=None, nfeats not in {'content','emotion'}.
    B, C, H, W = 2, 28, 32, 4       # (b, c, h, w); seq_len = W, combined_latent = H
    seq_len, hidden = W, 32
    Cin = C * W                      # 28 * seq_len = 112

    key = jax.random.PRNGKey(0)
    ks = jax.random.split(key, 9)
    sc = 0.05
    params = {
        "w1": jax.random.normal(ks[0], (seq_len, Cin, 3), jnp.float32) * sc,
        "b1": jax.random.normal(ks[1], (seq_len,), jnp.float32) * sc,
        "w2": jax.random.normal(ks[2], (seq_len, seq_len, 3), jnp.float32) * sc,
        "b2": jax.random.normal(ks[3], (seq_len,), jnp.float32) * sc,
        "wds": jax.random.normal(ks[4], (seq_len, Cin, 1), jnp.float32) * sc,
        "bds": jax.random.normal(ks[5], (seq_len,), jnp.float32) * sc,
        "wp": jax.random.normal(ks[6], (hidden, H), jnp.float32) * sc,
        "bp": jax.random.normal(ks[7], (hidden,), jnp.float32) * sc,
    }
    x = jax.random.normal(ks[8], (B, C, H, W), jnp.float32)

    fwd, packed = build_forward(params, batch_size=B)
    out = jax.block_until_ready(fwd(x, packed))
    ref = jax.block_until_ready(ref_forward(x, params))
    assert out.shape == (B, seq_len, hidden)
    # bf16 matmul inputs with f32 accumulation -> modest tolerance vs f32 reference.
    np.testing.assert_allclose(np.asarray(out), np.asarray(ref),
                               rtol=2e-2, atol=2e-2)
    # TODO(synk): disentangled_audio branch (plain Linear for nfeats in
    # {'content','emotion'}) and multi-level TCN (tcn_channels != None) are not
    # exercised; the config used selects single-level TCN + nonlinear emb_proj.
    print("KERNEL_OK")
</pallas_src>

<mosaic_0001>
module attributes {stable_mosaic.version = 11 : i64} {
  func.func @audionet_kernel(%arg0: i32, %arg1: memref<128x128xbf16, #tpu.memory_space<vmem>>, %arg2: memref<2x128xf32, #tpu.memory_space<vmem>>, %arg3: memref<12x384xbf16, #tpu.memory_space<vmem>>, %arg4: memref<4x12xbf16, #tpu.memory_space<vmem>>, %arg5: memref<128x128xbf16, #tpu.memory_space<vmem>>, %arg6: memref<1x128xf32, #tpu.memory_space<vmem>>, %arg7: memref<4x128xf32, #tpu.memory_space<vmem>>) attributes {dimension_semantics = [#tpu.dimension_semantics<parallel>], iteration_bounds = array<i64: 1>, scalar_prefetch = 0 : i64, scratch_operands = 0 : i64, tpu.core_type = #tpu.core_type<tc>, window_params = [{transform_indices = @transform_0, window_bounds = array<i64: 128, 128>}, {pipeline_mode = #tpu.pipeline_mode<synchronous>, transform_indices = @transform_1, window_bounds = array<i64: 2, 128>}, {pipeline_mode = #tpu.pipeline_mode<synchronous>, transform_indices = @transform_2, window_bounds = array<i64: 12, 384>}, {pipeline_mode = #tpu.pipeline_mode<synchronous>, transform_indices = @transform_3, window_bounds = array<i64: 4, 12>}, {pipeline_mode = #tpu.pipeline_mode<synchronous>, transform_indices = @transform_4, window_bounds = array<i64: 128, 128>}, {pipeline_mode = #tpu.pipeline_mode<synchronous>, transform_indices = @transform_5, window_bounds = array<i64: 1, 128>}, {transform_indices = @transform_6, window_bounds = array<i64: 4, 128>}]} {
    %c0 = arith.constant 0 : index
    %c0_0 = arith.constant 0 : index
    %0 = vector.load %arg1[%c0, %c0_0] : memref<128x128xbf16, #tpu.memory_space<vmem>>, vector<128x128xbf16>
    %c0_1 = arith.constant 0 : index
    %c0_2 = arith.constant 0 : index
    %1 = vector.load %arg2[%c0_1, %c0_2] : memref<2x128xf32, #tpu.memory_space<vmem>>, vector<1x128xf32>
    %c1 = arith.constant 1 : index
    %c0_3 = arith.constant 0 : index
    %2 = vector.load %arg2[%c1, %c0_3] : memref<2x128xf32, #tpu.memory_space<vmem>>, vector<1x128xf32>
    %cst = arith.constant 0.000000e+00 : bf16
    %3 = vector.broadcast %cst : bf16 to vector<128x2xbf16>
    %4 = vector.extract_strided_slice %0 {offsets = [0, 0], sizes = [128, 126], strides = [1, 1]} : vector<128x128xbf16> to vector<128x126xbf16>
    %5 = tpu.concatenate %3, %4 in 1 : vector<128x2xbf16>, vector<128x126xbf16> -> vector<128x128xbf16>
    %6 = arith.truncf %2 : vector<1x128xf32> to vector<1x128xbf16>
    %7 = vector.broadcast %6 : vector<1x128xbf16> to vector<128x128xbf16>
    %8 = arith.mulf %5, %7 : vector<128x128xbf16>
    %cst_4 = arith.constant 0.000000e+00 : bf16
    %9 = vector.broadcast %cst_4 : bf16 to vector<128x1xbf16>
    %10 = vector.extract_strided_slice %0 {offsets = [0, 0], sizes = [128, 127], strides = [1, 1]} : vector<128x128xbf16> to vector<128x127xbf16>
    %11 = tpu.concatenate %9, %10 in 1 : vector<128x1xbf16>, vector<128x127xbf16> -> vector<128x128xbf16>
    %12 = arith.truncf %1 : vector<1x128xf32> to vector<1x128xbf16>
    %13 = vector.broadcast %12 : vector<1x128xbf16> to vector<128x128xbf16>
    %14 = arith.mulf %11, %13 : vector<128x128xbf16>
    %15 = tpu.concatenate %8, %14, %0 in 0 : vector<128x128xbf16>, vector<128x128xbf16>, vector<128x128xbf16> -> vector<384x128xbf16>
    %c0_5 = arith.constant 0 : index
    %c0_6 = arith.constant 0 : index
    %16 = vector.load %arg3[%c0_5, %c0_6] : memref<12x384xbf16, #tpu.memory_space<vmem>>, vector<12x384xbf16>
    %cst_7 = arith.constant dense<0.000000e+00> : vector<12x128xf32>
    %17 = tpu.matmul %16, %15, %cst_7 {dimension_numbers = #tpu.dot_dimension_numbers<[1], [0], [0], [1], [0, 0, 1, 1], [], []>} : vector<12x384xbf16>, vector<384x128xbf16>, vector<12x128xf32> -> vector<12x128xf32>
    %18 = vector.extract_strided_slice %17 {offsets = [0, 0], sizes = [4, 128], strides = [1, 1]} : vector<12x128xf32> to vector<4x128xf32>
    %cst_8 = arith.constant 0.000000e+00 : f32
    %19 = vector.broadcast %cst_8 : f32 to vector<4x128xf32>
    %20 = arith.maximumf %18, %19 : vector<4x128xf32>
    %21 = vector.extract_strided_slice %17 {offsets = [4, 0], sizes = [4, 128], strides = [1, 1]} : vector<12x128xf32> to vector<4x128xf32>
    %22 = vector.extract_strided_slice %17 {offsets = [8, 0], sizes = [4, 128], strides = [1, 1]} : vector<12x128xf32> to vector<4x128xf32>
    %cst_9 = arith.constant 0.000000e+00 : f32
    %23 = vector.broadcast %cst_9 : f32 to vector<4x2xf32>
    %24 = vector.extract_strided_slice %20 {offsets = [0, 0], sizes = [4, 126], strides = [1, 1]} : vector<4x128xf32> to vector<4x126xf32>
    %25 = tpu.concatenate %23, %24 in 1 : vector<4x2xf32>, vector<4x126xf32> -> vector<4x128xf32>
    %26 = vector.broadcast %2 : vector<1x128xf32> to vector<4x128xf32>
    %27 = arith.mulf %25, %26 : vector<4x128xf32>
    %cst_10 = arith.constant 0.000000e+00 : f32
    %28 = vector.broadcast %cst_10 : f32 to vector<4x1xf32>
    %29 = vector.extract_strided_slice %20 {offsets = [0, 0], sizes = [4, 127], strides = [1, 1]} : vector<4x128xf32> to vector<4x127xf32>
    %30 = tpu.concatenate %28, %29 in 1 : vector<4x1xf32>, vector<4x127xf32> -> vector<4x128xf32>
    %31 = vector.broadcast %1 : vector<1x128xf32> to vector<4x128xf32>
    %32 = arith.mulf %30, %31 : vector<4x128xf32>
    %33 = tpu.concatenate %27, %32, %20 in 0 : vector<4x128xf32>, vector<4x128xf32>, vector<4x128xf32> -> vector<12x128xf32>
    %c0_11 = arith.constant 0 : index
    %c0_12 = arith.constant 0 : index
    %34 = vector.load %arg4[%c0_11, %c0_12] : memref<4x12xbf16, #tpu.memory_space<vmem>>, vector<4x12xbf16>
    %35 = arith.truncf %33 : vector<12x128xf32> to vector<12x128xbf16>
    %cst_13 = arith.constant dense<0.000000e+00> : vector<4x128xf32>
    %36 = tpu.matmul %34, %35, %cst_13 {dimension_numbers = #tpu.dot_dimension_numbers<[1], [0], [0], [1], [0, 0, 1, 1], [], []>} : vector<4x12xbf16>, vector<12x128xbf16>, vector<4x128xf32> -> vector<4x128xf32>
    %37 = arith.addf %36, %22 : vector<4x128xf32>
    %cst_14 = arith.constant 0.000000e+00 : f32
    %38 = vector.broadcast %cst_14 : f32 to vector<4x128xf32>
    %39 = arith.maximumf %37, %38 : vector<4x128xf32>
    %40 = arith.addf %39, %21 : vector<4x128xf32>
    %cst_15 = arith.constant 0.000000e+00 : f32
    %41 = vector.broadcast %cst_15 : f32 to vector<4x128xf32>
    %42 = arith.maximumf %40, %41 : vector<4x128xf32>
    %43 = arith.truncf %42 : vector<4x128xf32> to vector<4x128xbf16>
    %c0_16 = arith.constant 0 : index
    %c0_17 = arith.constant 0 : index
    %44 = vector.load %arg5[%c0_16, %c0_17] : memref<128x128xbf16, #tpu.memory_space<vmem>>, vector<128x128xbf16>
    %cst_18 = arith.constant dense<0.000000e+00> : vector<4x128xf32>
    %45 = tpu.matmul %43, %44, %cst_18 {dimension_numbers = #tpu.dot_dimension_numbers<[1], [0], [0], [1], [0, 0, 1, 1], [], []>} : vector<4x128xbf16>, vector<128x128xbf16>, vector<4x128xf32> -> vector<4x128xf32>
    %c0_19 = arith.constant 0 : index
    %c0_20 = arith.constant 0 : index
    %46 = vector.load %arg6[%c0_19, %c0_20] : memref<1x128xf32, #tpu.memory_space<vmem>>, vector<1x128xf32>
    %47 = vector.broadcast %46 : vector<1x128xf32> to vector<4x128xf32>
    %48 = arith.addf %45, %47 : vector<4x128xf32>
    %c0_21 = arith.constant 0 : index
    %c0_22 = arith.constant 0 : index
    %49 = vector.load %arg7[%c0_21, %c0_22] : memref<4x128xf32, #tpu.memory_space<vmem>>, vector<4x128xf32>
    tpu.vector_store %arg7[%c0_21, %c0_22], %48 {strides = array<i32>} : memref<4x128xf32, #tpu.memory_space<vmem>>, vector<4x128xf32>,
    return
  }
  func.func @transform_0(%arg0: i32) -> (i32, i32) {
    %c0_i32 = arith.constant 0 : i32
    %c0_i32_0 = arith.constant 0 : i32
    return %c0_i32, %arg0 : i32, i32
  }
  func.func @transform_1(%arg0: i32) -> (i32, i32) {
    %c0_i32 = arith.constant 0 : i32
    %c0_i32_0 = arith.constant 0 : i32
    %c0_i32_1 = arith.constant 0 : i32
    return %c0_i32, %c0_i32_0 : i32, i32
  }
  func.func @transform_2(%arg0: i32) -> (i32, i32) {
    %c0_i32 = arith.constant 0 : i32
    %c0_i32_0 = arith.constant 0 : i32
    %c0_i32_1 = arith.constant 0 : i32
    return %c0_i32, %c0_i32_0 : i32, i32
  }
  func.func @transform_3(%arg0: i32) -> (i32, i32) {
    %c0_i32 = arith.constant 0 : i32
    %c0_i32_0 = arith.constant 0 : i32
    %c0_i32_1 = arith.constant 0 : i32
    return %c0_i32, %c0_i32_0 : i32, i32
  }
  func.func @transform_4(%arg0: i32) -> (i32, i32) {
    %c0_i32 = arith.constant 0 : i32
    %c0_i32_0 = arith.constant 0 : i32
    %c0_i32_1 = arith.constant 0 : i32
    return %c0_i32, %c0_i32_0 : i32, i32
  }
  func.func @transform_5(%arg0: i32) -> (i32, i32) {
    %c0_i32 = arith.constant 0 : i32
    %c0_i32_0 = arith.constant 0 : i32
    %c0_i32_1 = arith.constant 0 : i32
    return %c0_i32, %c0_i32_0 : i32, i32
  }
  func.func @transform_6(%arg0: i32) -> (i32, i32) {
    %c0_i32 = arith.constant 0 : i32
    %c0_i32_0 = arith.constant 0 : i32
    return %c0_i32, %arg0 : i32, i32
  }
}

</mosaic_0001>

<bundles_post_ra>
// kernel: audionet_apply.1
= control target key start
LH: loop header
LB: loop body
LE: loop exit
PB: predicated region body
PF: predicated region fallthrough
CT: control target
= control target key end

     0   :  { %s675_s27 = smov 2   ;;  %s676_s28 = smov 1   ;;  %vm98_vm0 = vcmask 15360   ;;  %vm194_vm1 = vcmask 7168   ;;  %vm456_vm2 = vcmask 1043456   ;;  %vm464_vm3 = vcmask 1045504   ;;  %s877_s0 = inlined_call_operand.vmem [shape: bf16[128,128], index: 0, kind: input, shape index: {}]   ;;  %s878_s1 = inlined_call_operand.vmem [shape: f32[2,128], index: 1, kind: input, shape index: {}]   ;;  %s879_s2 = inlined_call_operand.vmem [shape: bf16[12,384], index: 2, kind: input, shape index: {}]   ;;  %s880_s4 = inlined_call_operand.vmem [shape: bf16[128,128], index: 4, kind: input, shape index: {}]   ;;  %s881_s3 = inlined_call_operand.vmem [shape: bf16[4,12], index: 3, kind: input, shape index: {}]   ;;  %s882_s5 = inlined_call_operand.vmem [shape: f32[1,128], index: 5, kind: input, shape index: {}]   ;;  %s883_s6 = inlined_call_operand.vmem [shape: f32[4,128], index: 6, kind: output, shape index: {}]  }
   0x1   :  { %v658_v0 = vld [vmem:[%s877_s0 + $0x38] sm:$0xff]  ;;  %v657_v1 = vld [vmem:[%s877_s0 + $0x30] sm:$0xff]  ;;  %v656_v2 = vld [vmem:[%s877_s0 + $0x28] sm:$0xff]  ;;  %vm460_vm4 = vcmask 97280  }
   0x2   :  { %96 = vrot.lane.b32.xlu0 %v658_v0, %s675_s27  ;;  %94 = vrot.lane.b32.xlu1 %v657_v1, %s675_s27  ;;  %v655_v3 = vld [vmem:[%s877_s0 + $0x20] sm:$0xff]  ;;  %v654_v4 = vld [vmem:[%s877_s0 + $0x18] sm:$0xff] }
   0x3   :  { %92 = vrot.lane.b32.xlu2 %v656_v2, %s675_s27  ;;  %425 = vmatpush.bf16.msra.mxu2 %v658_v0  ;;  %v653_v5 = vld [vmem:[%s877_s0 + $0x10] sm:$0xff]  ;;  %v652_v6 = vld [vmem:[%s877_s0 + $0x8] sm:$0xff]  ;;  %v651_v7 = vld [vmem:[%s877_s0] sm:$0xff] }
   0x4   :  { %v41_v9 = vld [vmem:[%s878_s1 + $0x1] sm:$0x1]  ;;  %v40_v12 = vld [vmem:[%s878_s1] sm:$0x1]  ;;  %v616_v61 = vld [vmem:[%s879_s2 + $0x8] sm:$0xf] }
   0x5   :  { %v124_v10 = vpack.c.bf16 %v41_v9, %v41_v9  ;;  %v219_v16 = vpack.c.bf16 %v40_v12, %v40_v12  ;;  %v661_v62 = vld [vmem:[%s879_s2 + $0x10] sm:$0x30] }
   0x7   :  { %426 = vmatpush.bf16.msra.mxu2 %v657_v1  ;;  %v126_v11 = vpack.i.b16 %v124_v10, %v124_v10  ;;  %v221_v20 = vpack.i.b16 %v219_v16, %v219_v16 }
   0x9   :  { %v128_v15 = vperm.slane %v126_v11, 0  ;;  %v223_v24 = vperm.slane %v221_v20, 0 }
   0xa   :  { %192 = vrot.lane.b32.xlu0 %v658_v0, %s676_s28  ;;  %190 = vrot.lane.b32.xlu1 %v657_v1, %s676_s28 }
   0xb   :  { %188 = vrot.lane.b32.xlu2 %v656_v2, %s676_s28  ;;  %427 = vmatpush.bf16.msra.mxu2 %v656_v2  ;;  %v759_v18 = vunpack.c.l.bf16 %v128_v15  ;;  %v767_v37 = vunpack.c.l.bf16 %v223_v24  ;;  %v617_v2 = vor.u32 %v661_v62, %v616_v61 }
   0xf   :  { %428 = vmatpush.bf16.msra.mxu2 %v655_v3 }
  0x12   :  { %90 = vrot.lane.b32.xlu0 %v655_v3, %s675_s27  ;;  %186 = vrot.lane.b32.xlu1 %v655_v3, %s676_s28 }
  0x13   :  { %88 = vrot.lane.b32.xlu2 %v654_v4, %s675_s27  ;;  %429 = vmatpush.bf16.msra.mxu2 %v654_v4 }
  0x17   :  { %430 = vmatpush.bf16.msra.mxu2 %v653_v5 }
  0x1a   :  { %184 = vrot.lane.b32.xlu0 %v654_v4, %s676_s28  ;;  %86 = vrot.lane.b32.xlu1 %v653_v5, %s675_s27 }
  0x1b   :  { %182 = vrot.lane.b32.xlu2 %v653_v5, %s676_s28  ;;  %431 = vmatpush.bf16.msra.mxu2 %v652_v6 }
  0x1f   :  { %432 = vmatpush.bf16.msra.mxu2 %v651_v7 }
  0x22   :  { %84 = vrot.lane.b32.xlu0 %v652_v6, %s675_s27  ;;  %180 = vrot.lane.b32.xlu1 %v652_v6, %s676_s28 }
  0x23   :  { %82 = vrot.lane.b32.xlu2 %v651_v7, %s675_s27  ;;  %433 = vmatmul.bf16.vlgmr.msra.gmra.mxu2 %v617_v2 }
  0x2a   :  { %178 = vrot.lane.b32.xlu0 %v651_v7, %s676_s28 }
  0x5d   :  { %v93_v8 = vpop.permute.xlu2 %92 }
  0x5e   :  { %v116_v14 = vsel %vm98_vm0, 0, %v93_v8 }
  0x5f   :  { %v139_v17 = vunpack.c.l.bf16 %v116_v14  ;;  %v140_v19 = vunpack.c.h.bf16 %v116_v14 }
  0x61   :  { %v156_v21 = vmul.f32 %v759_v18, %v139_v17  ;;  %v157_v23 = vmul.f32 %v759_v18, %v140_v19 }
  0x63   :  { %v172_v32 = vpack.c.bf16 %v156_v21, %v156_v21  ;;  %v173_v39 = vpack.c.bf16 %v157_v23, %v157_v23 }
  0x65   :  { %v189_v13 = vpop.permute.xlu2 %188  ;;  %v774_v46 = vunpack.c.l.b16 %v172_v32  ;;  %v300_v52 = vunpack.c.l.b16 %v173_v39 }
  0x66   :  { %v211_v22 = vsel %vm194_vm1, 0, %v189_v13 }
  0x67   :  { %v234_v31 = vunpack.c.l.bf16 %v211_v22  ;;  %v235_v38 = vunpack.c.h.bf16 %v211_v22  ;;  %v310_v17 = vpack.c.b16 %v300_v52, %v774_v46 }
  0x69   :  { %v251_v45 = vmul.f32 %v767_v37, %v234_v31  ;;  %v252_v51 = vmul.f32 %v767_v37, %v235_v38 }
  0x6b   :  { %v267_v1 = vpack.c.bf16 %v251_v45, %v251_v45  ;;  %v268_v9 = vpack.c.bf16 %v252_v51, %v252_v51 }
  0x6d   :  { %v89_v25 = vpop.permute.xlu2 %88  ;;  %v347_v24 = vunpack.c.l.b16 %v267_v1 }
  0x6e   :  { %v110_v28 = vsel %vm98_vm0, 0, %v89_v25  ;;  %v348_v25 = vunpack.c.l.b16 %v268_v9 }
  0x6f   :  { %v135_v40 = vunpack.c.l.bf16 %v110_v28  ;;  %v136_v53 = vunpack.c.h.bf16 %v110_v28 }
  0x71   :  { %v152_v54 = vmul.f32 %v759_v18, %v135_v40  ;;  %v153_v8 = vmul.f32 %v759_v18, %v136_v53 }
  0x73   :  { %v168_v11 = vpack.c.bf16 %v152_v54, %v152_v54 }
  0x74   :  { %v97_v26 = vpop.permute.xlu0 %96  ;;  %v95_v27 = vpop.permute.xlu1 %94 }
  0x75   :  { %v122_v29 = vsel %vm98_vm0, 0, %v97_v26  ;;  %v119_v30 = vsel %vm98_vm0, 0, %v95_v27  ;;  %v183_v10 = vpop.permute.xlu2 %182  ;;  %v169_v26 = vpack.c.bf16 %v153_v8, %v153_v8  ;;  %v793_v32 = vunpack.c.l.b16 %v168_v11 }
  0x76   :  { %v143_v33 = vunpack.c.l.bf16 %v122_v29  ;;  %v144_v34 = vunpack.c.h.bf16 %v122_v29  ;;  %v141_v35 = vunpack.c.l.bf16 %v119_v30  ;;  %v142_v36 = vunpack.c.h.bf16 %v119_v30 }
  0x77   :  { %v202_v22 = vsel %vm194_vm1, 0, %v183_v10  ;;  %v296_v45 = vunpack.c.l.b16 %v169_v26 }
  0x78   :  { %v158_v41 = vmul.f32 %v759_v18, %v141_v35  ;;  %v159_v42 = vmul.f32 %v759_v18, %v142_v36  ;;  %v160_v43 = vmul.f32 %v759_v18, %v143_v33  ;;  %v161_v44 = vmul.f32 %v759_v18, %v144_v34 }
  0x79   :  { %v228_v36 = vunpack.c.l.bf16 %v202_v22 }
  0x7a   :  { %v176_v47 = vpack.c.bf16 %v160_v43, %v160_v43  ;;  %v177_v48 = vpack.c.bf16 %v161_v44, %v161_v44  ;;  %v174_v49 = vpack.c.bf16 %v158_v41, %v158_v41  ;;  %v175_v50 = vpack.c.bf16 %v159_v42, %v159_v42 }
  0x7b   :  { %v229_v44 = vunpack.c.h.bf16 %v202_v22 }
  0x7c   :  { %v193_v55 = vpop.permute.xlu0 %192  ;;  %v303_v56 = vunpack.c.l.b16 %v176_v47  ;;  %v304_v57 = vunpack.c.l.b16 %v177_v48  ;;  %v191_v58 = vpop.permute.xlu1 %190  ;;  %v301_v59 = vunpack.c.l.b16 %v174_v49  ;;  %v302_v60 = vunpack.c.l.b16 %v175_v50 }
  0x7d   :  { %v217_v63 = vsel %vm194_vm1, 0, %v193_v55  ;;  %v214_v0 = vsel %vm194_vm1, 0, %v191_v58  ;;  %v245_v50 = vmul.f32 %v767_v37, %v228_v36  ;;  %v83_v51 = vpop.permute.xlu2 %82  ;;  %v358_v55 = vpack.c.b16 %v348_v25, %v347_v24 }
  0x7e   :  { %v238_v3 = vunpack.c.l.bf16 %v217_v63  ;;  %v239_v4 = vunpack.c.h.bf16 %v217_v63  ;;  %v312_v5 = vpack.c.b16 %v304_v57, %v303_v56  ;;  %v236_v6 = vunpack.c.l.bf16 %v214_v0 }
  0x7f   :  { %v237_v7 = vunpack.c.h.bf16 %v214_v0  ;;  %v311_v13 = vpack.c.b16 %v302_v60, %v301_v59  ;;  %v246_v56 = vmul.f32 %v767_v37, %v229_v44  ;;  %v308_v58 = vpack.c.b16 %v296_v45, %v793_v32 }
  0x80   :  { %397 = vmatpush.bf16.msra.mxu0 %v312_v5  ;;  %v253_v12 = vmul.f32 %v767_v37, %v236_v6  ;;  %v255_v14 = vmul.f32 %v767_v37, %v238_v3  ;;  %v256_v15 = vmul.f32 %v767_v37, %v239_v4  ;;  %v101_v0 = vsel %vm98_vm0, 0, %v83_v51 }
  0x81   :  { %v254_v16 = vmul.f32 %v767_v37, %v237_v7  ;;  %v261_v4 = vpack.c.bf16 %v245_v50, %v245_v50  ;;  %v129_v11 = vunpack.c.l.bf16 %v101_v0 }
  0x82   :  { %v271_v19 = vpack.c.bf16 %v255_v14, %v255_v14  ;;  %v272_v20 = vpack.c.bf16 %v256_v15, %v256_v15  ;;  %v269_v21 = vpack.c.bf16 %v253_v12, %v253_v12  ;;  %v262_v12 = vpack.c.bf16 %v246_v56, %v246_v56 }
  0x83   :  { %v270_v23 = vpack.c.bf16 %v254_v16, %v254_v16  ;;  %v130_v16 = vunpack.c.h.bf16 %v101_v0  ;;  %v146_v22 = vmul.f32 %v759_v18, %v129_v11  ;;  %v341_v24 = vunpack.c.l.b16 %v261_v4  ;;  %v660_v4 = vld [vmem:[%s879_s2 + $0x8] sm:$0x30] }
  0x84   :  { %398 = vmatpush.bf16.msra.mxu0 %v311_v13  ;;  %v91_v27 = vpop.permute.xlu0 %90  ;;  %v351_v28 = vunpack.c.l.b16 %v271_v19  ;;  %v352_v29 = vunpack.c.l.b16 %v272_v20  ;;  %v187_v30 = vpop.permute.xlu1 %186  ;;  %v349_v31 = vunpack.c.l.b16 %v269_v21  ;;  %v342_v25 = vunpack.c.l.b16 %v262_v12 }
  0x85   :  { %v113_v33 = vsel %vm98_vm0, 0, %v91_v27  ;;  %v208_v34 = vsel %vm194_vm1, 0, %v187_v30  ;;  %v350_v35 = vunpack.c.l.b16 %v270_v23  ;;  %v147_v30 = vmul.f32 %v759_v18, %v130_v16 }
  0x86   :  { %v137_v38 = vunpack.c.l.bf16 %v113_v33  ;;  %v138_v39 = vunpack.c.h.bf16 %v113_v33  ;;  %v360_v40 = vpack.c.b16 %v352_v29, %v351_v28  ;;  %v232_v41 = vunpack.c.l.bf16 %v208_v34 }
  0x87   :  { %v233_v42 = vunpack.c.h.bf16 %v208_v34  ;;  %v359_v43 = vpack.c.b16 %v350_v35, %v349_v31 }
  0x88   :  { %v154_v46 = vmul.f32 %v759_v18, %v137_v38  ;;  %v155_v47 = vmul.f32 %v759_v18, %v138_v39  ;;  %399 = vmatpush.bf16.msra.mxu0 %v310_v17  ;;  %411 = vmatpush.bf16.msra.mxu1 %v360_v40  ;;  %v249_v48 = vmul.f32 %v767_v37, %v232_v41 }
  0x89   :  { %v250_v49 = vmul.f32 %v767_v37, %v233_v42  ;;  %v355_v42 = vpack.c.b16 %v342_v25, %v341_v24 }
  0x8a   :  { %v170_v52 = vpack.c.bf16 %v154_v46, %v154_v46  ;;  %v171_v53 = vpack.c.bf16 %v155_v47, %v155_v47  ;;  %v265_v54 = vpack.c.bf16 %v249_v48, %v249_v48  ;;  %v163_v47 = vpack.c.bf16 %v147_v30, %v147_v30 }
  0x8b   :  { %v266_v57 = vpack.c.bf16 %v250_v49, %v250_v49 }
  0x8c   :  { %412 = vmatpush.bf16.msra.mxu1 %v359_v43  ;;  %v185_v59 = vpop.permute.xlu0 %184  ;;  %v297_v60 = vunpack.c.l.b16 %v170_v52  ;;  %v298_v61 = vunpack.c.l.b16 %v171_v53  ;;  %v87_v62 = vpop.permute.xlu1 %86  ;;  %v345_v63 = vunpack.c.l.b16 %v265_v54  ;;  %v162_v43 = vpack.c.bf16 %v146_v22, %v146_v22  ;;  %v672_v22 = vld [vmem:[%s878_s1 + $0x1] ss:$0 sm:$0xff] }
  0x8d   :  { %v205_v1 = vsel %vm194_vm1, 0, %v185_v59  ;;  %v107_v2 = vsel %vm98_vm0, 0, %v87_v62  ;;  %v346_v3 = vunpack.c.l.b16 %v266_v57  ;;  %v290_v57 = vunpack.c.l.b16 %v163_v47 }
  0x8e   :  { %v230_v5 = vunpack.c.l.bf16 %v205_v1  ;;  %v231_v6 = vunpack.c.h.bf16 %v205_v1  ;;  %v309_v7 = vpack.c.b16 %v298_v61, %v297_v60  ;;  %v133_v8 = vunpack.c.l.bf16 %v107_v2 }
  0x8f   :  { %v134_v9 = vunpack.c.h.bf16 %v107_v2  ;;  %v357_v10 = vpack.c.b16 %v346_v3, %v345_v63  ;;  %v289_v52 = vunpack.c.l.b16 %v162_v43  ;;  %v608_v3 = vld [vmem:[%s879_s2] sm:$0xf] }
  0x90   :  { %v247_v13 = vmul.f32 %v767_v37, %v230_v5  ;;  %v248_v14 = vmul.f32 %v767_v37, %v231_v6  ;;  %400 = vmatpush.bf16.msra.mxu0 %v309_v7  ;;  %413 = vmatpush.bf16.msra.mxu1 %v358_v55  ;;  %v150_v15 = vmul.f32 %v759_v18, %v133_v8 }
  0x91   :  { %v151_v17 = vmul.f32 %v759_v18, %v134_v9  ;;  %v305_v2 = vpack.c.b16 %v290_v57, %v289_v52  ;;  %v609_v7 = vor.u32 %v660_v4, %v608_v3 }
  0x92   :  { %v263_v19 = vpack.c.bf16 %v247_v13, %v247_v13  ;;  %v264_v20 = vpack.c.bf16 %v248_v14, %v248_v14  ;;  %v166_v21 = vpack.c.bf16 %v150_v15, %v150_v15 }
  0x93   :  { %v167_v23 = vpack.c.bf16 %v151_v17, %v151_v17 }
  0x94   :  { %414 = vmatpush.bf16.msra.mxu1 %v357_v10  ;;  %v85_v26 = vpop.permute.xlu0 %84  ;;  %401 = vmatpush.bf16.msra.mxu0 %v308_v58  ;;  %v343_v27 = vunpack.c.l.b16 %v263_v19  ;;  %v344_v28 = vunpack.c.l.b16 %v264_v20  ;;  %v181_v29 = vpop.permute.xlu1 %180  ;;  %v293_v31 = vunpack.c.l.b16 %v166_v21  ;;  %v610_v10 = vld [vmem:[%s879_s2 + $0xc] sm:$0x30]  ;;  %v673_v21 = vld [vmem:[%s878_s1] ss:$0 sm:$0xff] }
  0x95   :  { %v104_v32 = vsel %vm98_vm0, 0, %v85_v26  ;;  %v199_v33 = vsel %vm194_vm1, 0, %v181_v29  ;;  %v294_v34 = vunpack.c.l.b16 %v167_v23 }
  0x96   :  { %v131_v35 = vunpack.c.l.bf16 %v104_v32  ;;  %v132_v36 = vunpack.c.h.bf16 %v104_v32  ;;  %v356_v38 = vpack.c.b16 %v344_v28, %v343_v27  ;;  %v226_v39 = vunpack.c.l.bf16 %v199_v33 }
  0x97   :  { %v227_v40 = vunpack.c.h.bf16 %v199_v33  ;;  %v307_v41 = vpack.c.b16 %v294_v34, %v293_v31  ;;  %v669_v31 = vld [vmem:[%s880_s4 + $0x38] sm:$0xff]  ;;  %v458_v33 = vld [vmem:[%s881_s3] sm:$0x3]  ;;  %v668_v34 = vld [vmem:[%s880_s4 + $0x30] sm:$0xff] }
  0x98   :  { %v148_v44 = vmul.f32 %v759_v18, %v131_v35  ;;  %v149_v45 = vmul.f32 %v759_v18, %v132_v36  ;;  %415 = vmatpush.bf16.msra.mxu1 %v356_v38  ;;  %v243_v46 = vmul.f32 %v767_v37, %v226_v39  ;;  %v667_v35 = vld [vmem:[%s880_s4 + $0x28] sm:$0xff]  ;;  %v666_v36 = vld [vmem:[%s880_s4 + $0x20] sm:$0xff]  ;;  %v665_v38 = vld [vmem:[%s880_s4 + $0x18] sm:$0xff] }
  0x99   :  { %v244_v48 = vmul.f32 %v767_v37, %v227_v40  ;;  %402 = vmatpush.bf16.msra.mxu0 %v307_v41  ;;  %v664_v39 = vld [vmem:[%s880_s4 + $0x10] sm:$0xff]  ;;  %v663_v40 = vld [vmem:[%s880_s4 + $0x8] sm:$0xff]  ;;  %v662_v41 = vld [vmem:[%s880_s4] sm:$0xff] }
  0x9a   :  { %v164_v49 = vpack.c.bf16 %v148_v44, %v148_v44  ;;  %v165_v50 = vpack.c.bf16 %v149_v45, %v149_v45  ;;  %v259_v51 = vpack.c.bf16 %v243_v46, %v243_v46 }
  0x9b   :  { %v260_v53 = vpack.c.bf16 %v244_v48, %v244_v48 }
  0x9c   :  { %v179_v54 = vpop.permute.xlu0 %178  ;;  %v291_v55 = vunpack.c.l.b16 %v164_v49  ;;  %v292_v56 = vunpack.c.l.b16 %v165_v50  ;;  %416 = vmatpush.bf16.msra.mxu1 %v355_v42  ;;  %v339_v58 = vunpack.c.l.b16 %v259_v51 }
  0x9d   :  { %v196_v18 = vsel %vm194_vm1, 0, %v179_v54  ;;  %v340_v59 = vunpack.c.l.b16 %v260_v53 }
  0x9e   :  { %v224_v60 = vunpack.c.l.bf16 %v196_v18  ;;  %v225_v61 = vunpack.c.h.bf16 %v196_v18  ;;  %v306_v62 = vpack.c.b16 %v292_v56, %v291_v55  ;;  %v674_v55 = vld [vmem:[%s882_s5] ss:$0 sm:$0xff] }
  0x9f   :  { %v354_v63 = vpack.c.b16 %v340_v59, %v339_v58 }
  0xa0   :  { %v241_v0 = vmul.f32 %v767_v37, %v224_v60  ;;  %v242_v1 = vmul.f32 %v767_v37, %v225_v61  ;;  %403 = vmatpush.bf16.msra.mxu0 %v306_v62  ;;  %v659_v37 = vld [vmem:[%s879_s2 + $0x4] sm:$0xf] }
  0xa1   :  { %417 = vmatpush.bf16.msra.mxu1 %v354_v63  ;;  %v613_v12 = vor.u32 %v659_v37, %v610_v10 }
  0xa2   :  { %v257_v5 = vpack.c.bf16 %v241_v0, %v241_v0  ;;  %v258_v6 = vpack.c.bf16 %v242_v1, %v242_v1 }
  0xa4   :  { %404 = vmatpush.bf16.msra.mxu0 %v305_v2  ;;  %v337_v8 = vunpack.c.l.b16 %v257_v5  ;;  %v338_v9 = vunpack.c.l.b16 %v258_v6 }
  0xa6   :  { %v353_v11 = vpack.c.b16 %v338_v9, %v337_v8  ;;  %v434_v16 = vpop.f32.mrf.mxu2 }
  0xa7   :  { %405 = vmatmul.bf16.vlgmr.msra.gmra.mxu0 %v609_v7 }
  0xa8   :  { %418 = vmatpush.bf16.msra.mxu1 %v353_v11 }
  0xab   :  { %419 = vmatmul.bf16.vlgmr.msra.gmra.mxu1 %v613_v12 }
  0xae   :  { %v436_v45 = vpop.f32.mrf.mxu2 }
 0x124   :  { %v406_v13 = vpop.f32.mrf.mxu0 }
 0x128   :  { %v420_v14 = vpop.f32.mrf.mxu1 }
 0x129   :  { %v421_v15 = vadd.f32 %v420_v14, %v406_v13 }
 0x12b   :  { %v435_v17 = vadd.f32 %v434_v16, %v421_v15 }
 0x12c   :  { %v408_v43 = vpop.f32.mrf.mxu0 }
 0x12d   :  { %v439_v19 = vmax.f32 %v435_v17, 0.0  ;;  %v483_v49 = vrot.slane %v435_v17, 4 }
 0x12f   :  { %441 = vrot.lane.b32.xlu2 %v439_v19, %s675_s27  ;;  %447 = vrot.lane.b32.xlu1 %v439_v19, %s676_s28 }
 0x130   :  { %v422_v42 = vpop.f32.mrf.mxu1 }
 0x131   :  { %v423_v44 = vadd.f32 %v422_v42, %v408_v43 }
 0x133   :  { %v437_v46 = vadd.f32 %v436_v45, %v423_v44 }
 0x189   :  { %v442_v20 = vpop.permute.xlu2 %441 }
 0x18a   :  { %v444_v24 = vsel %vm98_vm0, 0.0, %v442_v20 }
 0x18b   :  { %v446_v27 = vmul.f32 %v672_v22, %v444_v24 }
 0x1a1   :  { %v448_v23 = vpop.permute.xlu1 %447 }
 0x1a2   :  { %v450_v25 = vsel %vm194_vm1, 0.0, %v448_v23 }
 0x1a3   :  { %v452_v26 = vmul.f32 %v673_v21, %v450_v25 }
 0x1a5   :  { %v454_v28 = vrot.slane %v452_v26, 4 }
 0x1a7   :  { %v457_v29 = vsel %vm456_vm2, %v446_v27, %v454_v28 }
 0x1a8   :  { %v459_v30 = vpack.c.bf16 %v439_v19, %v457_v29 }
 0x1aa   :  { %v466_v32 = vsel %vm464_vm3, %v459_v30, 0 }
 0x1ab   :  { %475 = vmatpush.bf16.msra.mxu3 %v466_v32 }
 0x1ae   :  { %618 = vmatmul.msk.bf16.vlgmr.msra.gmra.mxu3 %vm460_vm4, %v458_v33 }
 0x1af   :  { %556 = vmatpush.bf16.msrb.mxu3 %v669_v31 }
 0x1b3   :  { %557 = vmatpush.bf16.msrb.mxu3 %v668_v34 }
 0x1b7   :  { %558 = vmatpush.bf16.msrb.mxu3 %v667_v35 }
 0x1bb   :  { %559 = vmatpush.bf16.msrb.mxu3 %v666_v36 }
 0x1bf   :  { %560 = vmatpush.bf16.msrb.mxu3 %v665_v38 }
 0x1c3   :  { %561 = vmatpush.bf16.msrb.mxu3 %v664_v39 }
 0x1c7   :  { %562 = vmatpush.bf16.msrb.mxu3 %v663_v40 }
 0x1cb   :  { %563 = vmatpush.bf16.msrb.mxu3 %v662_v41 }
 0x231   :  { %v477_v47 = vpop.f32.mrf.mxu3 }
 0x232   :  { %v478_v48 = vadd.f32 %v477_v47, %v437_v46 }
 0x234   :  { %v481_v50 = vmax.f32 %v478_v48, 0.0 }
 0x236   :  { %v485_v51 = vadd.f32 %v483_v49, %v481_v50 }
 0x238   :  { %v486_v52 = vmax.f32 %v485_v51, 0.0 }
 0x239   :  { %v479_v53 = vpop.f32.mrf.mxu3 }
 0x23a   :  { %v487_v54 = vpack.c.bf16 %v486_v52, %v486_v52 }
 0x23c   :  { %564 = vmatmul.bf16.vlgmr.msrb.gmra.mxu3 %v487_v54 }
 0x2bf   :  { %v565_v56 = vpop.f32.mrf.mxu3 }
 0x2c0   :  { %v566_v57 = vadd.f32 %v674_v55, %v565_v56 }
 0x2c2   :  { %569 = vst [vmem:[%s883_s6] sm:$0xf] %v566_v57 }
 0x2c7   :  { %v567_v58 = vpop.f32.mrf.mxu3 }

</bundles_post_ra>
